<compile_context>
chip_gen: v7x
topology: tpu7x:2x2x1
jax: 0.10.0
libtpu: 0.0.40
codegen_flags: <defaults>
</compile_context>

<pallas_src>
import functools

import jax
import jax.numpy as jnp
import numpy as np
from jax import lax
from jax.experimental import pallas as pl
from jax.experimental.pallas import tpu as pltpu


def _mha_kernel(q_ref, k_ref, v_ref, mask_ref,
                wq_ref, wk_ref, wv_ref, wf_ref,
                out_ref, *attn_refs,
                n_heads, d_k, d_v, compute_dtype):
    """One grid step = one batch element; all heads fused inside."""
    H = n_heads

    q = q_ref[...]          # [L, d_model] (compute_dtype)
    k = k_ref[...]          # [L, d_model]
    v = v_ref[...]          # [L, d_model]
    mask = mask_ref[...]    # [L, L] float32 (1.0 = masked, 0.0 = keep)

    # Fused all-head projections (single MXU matmuls, f32 accumulation).
    # 1/sqrt(d_k) is already folded into wq_ref by the wrapper.
    qp = jnp.dot(q, wq_ref[...],
                 preferred_element_type=jnp.float32).astype(compute_dtype)  # [L, H*d_k]
    kp = jnp.dot(k, wk_ref[...],
                 preferred_element_type=jnp.float32).astype(compute_dtype)  # [L, H*d_k]
    vp = jnp.dot(v, wv_ref[...],
                 preferred_element_type=jnp.float32).astype(compute_dtype)  # [L, H*d_v]

    neg = mask * jnp.float32(1e9)   # computed once, reused for every head

    ctx_heads = []
    for h in range(H):  # H is small & static -> unrolled
        qh = qp[:, h * d_k:(h + 1) * d_k]    # [L, d_k]
        kh = kp[:, h * d_k:(h + 1) * d_k]    # [L, d_k]
        vh = vp[:, h * d_v:(h + 1) * d_v]    # [L, d_v]

        # scores[i, j] = sum_d qh[i, d] * kh[j, d]  (no explicit transpose)
        s = lax.dot_general(qh, kh, (((1,), (1,)), ((), ())),
                            preferred_element_type=jnp.float32)       # [L, L]
        s = s - neg
        s = s - jnp.max(s, axis=-1, keepdims=True)
        e = jnp.exp(s)
        p = e * pl.reciprocal(jnp.sum(e, axis=-1, keepdims=True), approx=True)

        if attn_refs:   # attention-weights output is optional
            attn_refs[0][h] = p.astype(attn_refs[0].dtype)

        ctx_heads.append(
            jnp.dot(p.astype(compute_dtype), vh,
                    preferred_element_type=jnp.float32))              # [L, d_v]

    ctx = jnp.concatenate(ctx_heads, axis=-1).astype(compute_dtype)   # [L, H*d_v]

    # Fused output projection over all heads at once.
    out = jnp.dot(ctx, wf_ref[...], preferred_element_type=jnp.float32)
    out_ref[...] = out.astype(out_ref.dtype)


def multi_head_attention(Q, K, V, attn_mask, wq, wk, wv, wfc,
                         *, d_k, d_v, n_heads,
                         compute_dtype=jnp.float32, return_attn=True):
    """Pallas fused MHA (basic_attn path).

    Q, K, V:   [B, L, d_model] float32
    attn_mask: [B, L, L] or [1, L, L] float32 (1.0 = masked, 0.0 = keep)
    wq, wk:    [d_k * n_heads, d_model]   (PyTorch nn.Linear weight layout)
    wv:        [d_v * n_heads, d_model]
    wfc:       [d_model, n_heads * d_v]
    compute_dtype: matmul input dtype (jnp.bfloat16 recommended on TPU;
                   accumulation is always f32).
    Returns (output [B, L, d_model], attn [B, H, L, L] or None, loss scalar).
    """
    B, L, d_model = Q.shape
    H = n_heads

    # Re-layout PyTorch Linear weights once in the wrapper:
    #   y = x @ W^T ; head h takes output columns [h*d_k : (h+1)*d_k].
    scale = jnp.float32(1.0 / np.sqrt(d_k))
    wq_all = (wq.T * scale).astype(compute_dtype)   # [d_model, H*d_k], scale folded
    wk_all = wk.T.astype(compute_dtype)             # [d_model, H*d_k]
    wv_all = wv.T.astype(compute_dtype)             # [d_model, H*d_v]
    wf_all = wfc.T.astype(compute_dtype)            # [H*d_v, d_model]

    Qc = Q.astype(compute_dtype)
    Kc = K.astype(compute_dtype)
    Vc = V.astype(compute_dtype)
    mask = attn_mask.astype(jnp.float32)
    mask_batched = (mask.shape[0] == B) and (B > 1)

    # Size-1 leading dims are squeezed (None) -> kernel sees 2-D refs.
    in_specs = [
        pl.BlockSpec((None, L, d_model), lambda b: (b, 0, 0)),   # Q
        pl.BlockSpec((None, L, d_model), lambda b: (b, 0, 0)),   # K
        pl.BlockSpec((None, L, d_model), lambda b: (b, 0, 0)),   # V
        pl.BlockSpec((None, L, L),
                     (lambda b: (b, 0, 0)) if mask_batched
                     else (lambda b: (0, 0, 0))),                # mask (resident if shared)
        pl.BlockSpec((d_model, H * d_k), lambda b: (0, 0)),      # WQ (resident)
        pl.BlockSpec((d_model, H * d_k), lambda b: (0, 0)),      # WK (resident)
        pl.BlockSpec((d_model, H * d_v), lambda b: (0, 0)),      # WV (resident)
        pl.BlockSpec((H * d_v, d_model), lambda b: (0, 0)),      # fc (resident)
    ]

    out_shapes = [jax.ShapeDtypeStruct((B, L, d_model), jnp.float32)]
    out_specs = [pl.BlockSpec((None, L, d_model), lambda b: (b, 0, 0))]
    if return_attn:
        # TODO(synk): for tiny L the (L, L) tail is lane-sparse; a lane-dense
        #             [B, L, H*L] slab + wrapper reshape would store faster.
        out_shapes.append(jax.ShapeDtypeStruct((B, H, L, L), jnp.float32))
        out_specs.append(pl.BlockSpec((None, H, L, L), lambda b: (b, 0, 0, 0)))

    kernel = functools.partial(_mha_kernel, n_heads=H, d_k=d_k, d_v=d_v,
                               compute_dtype=compute_dtype)

    results = pl.pallas_call(
        kernel,
        out_shape=tuple(out_shapes),
        grid_spec=pltpu.PrefetchScalarGridSpec(
            num_scalar_prefetch=0,
            grid=(B,),
            in_specs=in_specs,
            out_specs=tuple(out_specs),
        ),
        compiler_params=pltpu.CompilerParams(
            dimension_semantics=("parallel",)),
    )(Qc, Kc, Vc, mask, wq_all, wk_all, wv_all, wf_all)

    if return_attn:
        out, attn = results
    else:
        (out,) = results
        attn = None
    loss = jnp.float32(0.0)
    return out, attn, loss


def _reference(Q, K, V, attn_mask, wq, wk, wv, wfc, *, d_k, d_v, n_heads):
    """Plain-JAX reference mirroring the PyTorch forward (basic_attn)."""
    B, L, d_model = Q.shape
    H = n_heads
    q_s = (Q @ wq.T).reshape(B, L, H, d_k).transpose(0, 2, 1, 3)
    k_s = (K @ wk.T).reshape(B, L, H, d_k).transpose(0, 2, 1, 3)
    v_s = (V @ wv.T).reshape(B, L, H, d_v).transpose(0, 2, 1, 3)
    scores = jnp.einsum("bhqd,bhkd->bhqk", q_s, k_s) / jnp.sqrt(jnp.float32(d_k))
    scores = scores - attn_mask[:, None, :, :] * 1e9
    attn = jax.nn.softmax(scores, axis=-1)
    ctx = jnp.einsum("bhqk,bhkd->bhqd", attn, v_s)
    ctx = ctx.transpose(0, 2, 1, 3).reshape(B, L, H * d_v)
    out = ctx @ wfc.T
    return out, attn


if __name__ == "__main__":
    # Small shapes consistent with the module.
    B, L = 2, 8
    d_model, d_k, d_v, n_heads = 32, 8, 8, 4

    key = jax.random.PRNGKey(0)
    kq, kk, kv, kwq, kwk, kwv, kwf = jax.random.split(key, 7)

    Q = jax.random.normal(kq, (B, L, d_model), dtype=jnp.float32)
    K = jax.random.normal(kk, (B, L, d_model), dtype=jnp.float32)
    V = jax.random.normal(kv, (B, L, d_model), dtype=jnp.float32)

    # Deterministic parameter init (PyTorch nn.Linear weight shapes, no bias).
    s = 1.0 / np.sqrt(d_model)
    wq = jax.random.uniform(kwq, (d_k * n_heads, d_model), jnp.float32, -s, s)
    wk = jax.random.uniform(kwk, (d_k * n_heads, d_model), jnp.float32, -s, s)
    wv = jax.random.uniform(kwv, (d_v * n_heads, d_model), jnp.float32, -s, s)
    sf = 1.0 / np.sqrt(n_heads * d_v)
    wfc = jax.random.uniform(kwf, (d_model, n_heads * d_v), jnp.float32, -sf, sf)

    # Causal mask: 1.0 = masked (future position), 0.0 = keep.
    # Shared across batch -> pass as [1, L, L]; kernel keeps it resident.
    attn_mask = jnp.triu(jnp.ones((L, L), jnp.float32), k=1)[None]

    ref_out, ref_attn = _reference(
        Q, K, V, attn_mask, wq, wk, wv, wfc,
        d_k=d_k, d_v=d_v, n_heads=n_heads)

    # --- f32 compute path ---
    out, attn, loss = multi_head_attention(
        Q, K, V, attn_mask, wq, wk, wv, wfc,
        d_k=d_k, d_v=d_v, n_heads=n_heads,
        compute_dtype=jnp.float32, return_attn=True)
    jax.block_until_ready((out, attn, loss))
    # (tolerances account for the approx EUP reciprocal in the softmax)
    np.testing.assert_allclose(np.asarray(out), np.asarray(ref_out),
                               rtol=2e-3, atol=2e-3)
    np.testing.assert_allclose(np.asarray(attn), np.asarray(ref_attn),
                               rtol=2e-3, atol=2e-3)

    # --- no-attn-output path (skips the [B,H,L,L] HBM writeback) ---
    out_na, attn_na, _ = multi_head_attention(
        Q, K, V, attn_mask, wq, wk, wv, wfc,
        d_k=d_k, d_v=d_v, n_heads=n_heads,
        compute_dtype=jnp.float32, return_attn=False)
    jax.block_until_ready(out_na)
    assert attn_na is None
    np.testing.assert_allclose(np.asarray(out_na), np.asarray(ref_out),
                               rtol=2e-3, atol=2e-3)

    # --- bf16 MXU inputs / f32 accumulation (recommended on v5e/v6e/v7x) ---
    out_bf, attn_bf, _ = multi_head_attention(
        Q, K, V, attn_mask, wq, wk, wv, wfc,
        d_k=d_k, d_v=d_v, n_heads=n_heads,
        compute_dtype=jnp.bfloat16, return_attn=True)
    jax.block_until_ready((out_bf, attn_bf))
    np.testing.assert_allclose(np.asarray(out_bf), np.asarray(ref_out),
                               rtol=5e-2, atol=5e-2)
    np.testing.assert_allclose(np.asarray(attn_bf), np.asarray(ref_attn),
                               rtol=5e-2, atol=5e-2)

    print("KERNEL_OK")
</pallas_src>

<mosaic_0001>
module attributes {stable_mosaic.version = 11 : i64} {
  func.func @_mha_kernel(%arg0: i32, %arg1: memref<1x8x32xf32, #tpu.memory_space<vmem>>, %arg2: memref<1x8x32xf32, #tpu.memory_space<vmem>>, %arg3: memref<1x8x32xf32, #tpu.memory_space<vmem>>, %arg4: memref<1x8x8xf32, #tpu.memory_space<vmem>>, %arg5: memref<32x32xf32, #tpu.memory_space<vmem>>, %arg6: memref<32x32xf32, #tpu.memory_space<vmem>>, %arg7: memref<32x32xf32, #tpu.memory_space<vmem>>, %arg8: memref<32x32xf32, #tpu.memory_space<vmem>>, %arg9: memref<1x8x32xf32, #tpu.memory_space<vmem>>, %arg10: memref<1x4x8x8xf32, #tpu.memory_space<vmem>>) attributes {dimension_semantics = [#tpu.dimension_semantics<parallel>], iteration_bounds = array<i64: 2>, scalar_prefetch = 0 : i64, scratch_operands = 0 : i64, tpu.core_type = #tpu.core_type<tc>, window_params = [{transform_indices = @transform_0, window_bounds = array<i64: 1, 8, 32>}, {transform_indices = @transform_1, window_bounds = array<i64: 1, 8, 32>}, {transform_indices = @transform_2, window_bounds = array<i64: 1, 8, 32>}, {pipeline_mode = #tpu.pipeline_mode<synchronous>, transform_indices = @transform_3, window_bounds = array<i64: 1, 8, 8>}, {pipeline_mode = #tpu.pipeline_mode<synchronous>, transform_indices = @transform_4, window_bounds = array<i64: 32, 32>}, {pipeline_mode = #tpu.pipeline_mode<synchronous>, transform_indices = @transform_5, window_bounds = array<i64: 32, 32>}, {pipeline_mode = #tpu.pipeline_mode<synchronous>, transform_indices = @transform_6, window_bounds = array<i64: 32, 32>}, {pipeline_mode = #tpu.pipeline_mode<synchronous>, transform_indices = @transform_7, window_bounds = array<i64: 32, 32>}, {transform_indices = @transform_8, window_bounds = array<i64: 1, 8, 32>}, {transform_indices = @transform_9, window_bounds = array<i64: 1, 4, 8, 8>}]} {
    %c0 = arith.constant 0 : index
    %c0_0 = arith.constant 0 : index
    %c0_1 = arith.constant 0 : index
    %0 = vector.load %arg1[%c0, %c0_0, %c0_1] : memref<1x8x32xf32, #tpu.memory_space<vmem>>, vector<1x8x32xf32>
    %1 = vector.shape_cast %0 : vector<1x8x32xf32> to vector<8x32xf32>
    %c0_2 = arith.constant 0 : index
    %c0_3 = arith.constant 0 : index
    %c0_4 = arith.constant 0 : index
    %2 = vector.load %arg2[%c0_2, %c0_3, %c0_4] : memref<1x8x32xf32, #tpu.memory_space<vmem>>, vector<1x8x32xf32>
    %3 = vector.shape_cast %2 : vector<1x8x32xf32> to vector<8x32xf32>
    %c0_5 = arith.constant 0 : index
    %c0_6 = arith.constant 0 : index
    %c0_7 = arith.constant 0 : index
    %4 = vector.load %arg3[%c0_5, %c0_6, %c0_7] : memref<1x8x32xf32, #tpu.memory_space<vmem>>, vector<1x8x32xf32>
    %5 = vector.shape_cast %4 : vector<1x8x32xf32> to vector<8x32xf32>
    %c0_8 = arith.constant 0 : index
    %c0_9 = arith.constant 0 : index
    %c0_10 = arith.constant 0 : index
    %6 = vector.load %arg4[%c0_8, %c0_9, %c0_10] : memref<1x8x8xf32, #tpu.memory_space<vmem>>, vector<1x8x8xf32>
    %7 = vector.shape_cast %6 : vector<1x8x8xf32> to vector<8x8xf32>
    %c0_11 = arith.constant 0 : index
    %c0_12 = arith.constant 0 : index
    %8 = vector.load %arg5[%c0_11, %c0_12] : memref<32x32xf32, #tpu.memory_space<vmem>>, vector<32x32xf32>
    %cst = arith.constant dense<0.000000e+00> : vector<8x32xf32>
    %9 = tpu.matmul %1, %8, %cst {dimension_numbers = #tpu.dot_dimension_numbers<[1], [0], [0], [1], [0, 0, 1, 1], [], []>} : vector<8x32xf32>, vector<32x32xf32>, vector<8x32xf32> -> vector<8x32xf32>
    %c0_13 = arith.constant 0 : index
    %c0_14 = arith.constant 0 : index
    %10 = vector.load %arg6[%c0_13, %c0_14] : memref<32x32xf32, #tpu.memory_space<vmem>>, vector<32x32xf32>
    %cst_15 = arith.constant dense<0.000000e+00> : vector<8x32xf32>
    %11 = tpu.matmul %3, %10, %cst_15 {dimension_numbers = #tpu.dot_dimension_numbers<[1], [0], [0], [1], [0, 0, 1, 1], [], []>} : vector<8x32xf32>, vector<32x32xf32>, vector<8x32xf32> -> vector<8x32xf32>
    %c0_16 = arith.constant 0 : index
    %c0_17 = arith.constant 0 : index
    %12 = vector.load %arg7[%c0_16, %c0_17] : memref<32x32xf32, #tpu.memory_space<vmem>>, vector<32x32xf32>
    %cst_18 = arith.constant dense<0.000000e+00> : vector<8x32xf32>
    %13 = tpu.matmul %5, %12, %cst_18 {dimension_numbers = #tpu.dot_dimension_numbers<[1], [0], [0], [1], [0, 0, 1, 1], [], []>} : vector<8x32xf32>, vector<32x32xf32>, vector<8x32xf32> -> vector<8x32xf32>
    %cst_19 = arith.constant 1.000000e+09 : f32
    %14 = vector.broadcast %cst_19 : f32 to vector<8x8xf32>
    %15 = arith.mulf %7, %14 : vector<8x8xf32>
    %16 = vector.extract_strided_slice %9 {offsets = [0, 0], sizes = [8, 8], strides = [1, 1]} : vector<8x32xf32> to vector<8x8xf32>
    %17 = vector.extract_strided_slice %11 {offsets = [0, 0], sizes = [8, 8], strides = [1, 1]} : vector<8x32xf32> to vector<8x8xf32>
    %18 = vector.extract_strided_slice %13 {offsets = [0, 0], sizes = [8, 8], strides = [1, 1]} : vector<8x32xf32> to vector<8x8xf32>
    %cst_20 = arith.constant dense<0.000000e+00> : vector<8x8xf32>
    %19 = tpu.matmul %16, %17, %cst_20 {dimension_numbers = #tpu.dot_dimension_numbers<[1], [1], [0], [0], [0, 0, 1, 0], [], []>} : vector<8x8xf32>, vector<8x8xf32>, vector<8x8xf32> -> vector<8x8xf32>
    %20 = arith.subf %19, %15 : vector<8x8xf32>
    %cst_21 = arith.constant dense<0xFF800000> : vector<8xf32>
    %21 = vector.multi_reduction <maximumf>, %20, %cst_21 [1] : vector<8x8xf32> to vector<8xf32>
    %22 = vector.shape_cast %21 : vector<8xf32> to vector<8x1xf32>
    %23 = vector.broadcast %22 : vector<8x1xf32> to vector<8x8xf32>
    %24 = arith.subf %20, %23 : vector<8x8xf32>
    %25 = math.exp %24 : vector<8x8xf32>
    %cst_22 = arith.constant dense<0.000000e+00> : vector<8xf32>
    %26 = vector.multi_reduction <add>, %25, %cst_22 [1] : vector<8x8xf32> to vector<8xf32>
    %27 = vector.shape_cast %26 : vector<8xf32> to vector<8x1xf32>
    %28 = tpu.reciprocal %27 {approx = true} : vector<8x1xf32> -> vector<8x1xf32>
    %29 = vector.broadcast %28 : vector<8x1xf32> to vector<8x8xf32>
    %30 = arith.mulf %25, %29 : vector<8x8xf32>
    %c0_23 = arith.constant 0 : index
    %c0_24 = arith.constant 0 : index
    %c0_25 = arith.constant 0 : index
    %c0_26 = arith.constant 0 : index
    %31 = vector.load %arg10[%c0_23, %c0_24, %c0_25, %c0_26] : memref<1x4x8x8xf32, #tpu.memory_space<vmem>>, vector<1x1x8x8xf32>
    %32 = vector.shape_cast %31 : vector<1x1x8x8xf32> to vector<8x8xf32>
    %33 = vector.shape_cast %30 : vector<8x8xf32> to vector<1x1x8x8xf32>
    tpu.vector_store %arg10[%c0_23, %c0_24, %c0_25, %c0_26], %33 {strides = array<i32>} : memref<1x4x8x8xf32, #tpu.memory_space<vmem>>, vector<1x1x8x8xf32>,
    %cst_27 = arith.constant dense<0.000000e+00> : vector<8x8xf32>
    %34 = tpu.matmul %30, %18, %cst_27 {dimension_numbers = #tpu.dot_dimension_numbers<[1], [0], [0], [1], [0, 0, 1, 1], [], []>} : vector<8x8xf32>, vector<8x8xf32>, vector<8x8xf32> -> vector<8x8xf32>
    %35 = vector.extract_strided_slice %9 {offsets = [0, 8], sizes = [8, 8], strides = [1, 1]} : vector<8x32xf32> to vector<8x8xf32>
    %36 = vector.extract_strided_slice %11 {offsets = [0, 8], sizes = [8, 8], strides = [1, 1]} : vector<8x32xf32> to vector<8x8xf32>
    %37 = vector.extract_strided_slice %13 {offsets = [0, 8], sizes = [8, 8], strides = [1, 1]} : vector<8x32xf32> to vector<8x8xf32>
    %cst_28 = arith.constant dense<0.000000e+00> : vector<8x8xf32>
    %38 = tpu.matmul %35, %36, %cst_28 {dimension_numbers = #tpu.dot_dimension_numbers<[1], [1], [0], [0], [0, 0, 1, 0], [], []>} : vector<8x8xf32>, vector<8x8xf32>, vector<8x8xf32> -> vector<8x8xf32>
    %39 = arith.subf %38, %15 : vector<8x8xf32>
    %cst_29 = arith.constant dense<0xFF800000> : vector<8xf32>
    %40 = vector.multi_reduction <maximumf>, %39, %cst_29 [1] : vector<8x8xf32> to vector<8xf32>
    %41 = vector.shape_cast %40 : vector<8xf32> to vector<8x1xf32>
    %42 = vector.broadcast %41 : vector<8x1xf32> to vector<8x8xf32>
    %43 = arith.subf %39, %42 : vector<8x8xf32>
    %44 = math.exp %43 : vector<8x8xf32>
    %cst_30 = arith.constant dense<0.000000e+00> : vector<8xf32>
    %45 = vector.multi_reduction <add>, %44, %cst_30 [1] : vector<8x8xf32> to vector<8xf32>
    %46 = vector.shape_cast %45 : vector<8xf32> to vector<8x1xf32>
    %47 = tpu.reciprocal %46 {approx = true} : vector<8x1xf32> -> vector<8x1xf32>
    %48 = vector.broadcast %47 : vector<8x1xf32> to vector<8x8xf32>
    %49 = arith.mulf %44, %48 : vector<8x8xf32>
    %c0_31 = arith.constant 0 : index
    %c1 = arith.constant 1 : index
    %c0_32 = arith.constant 0 : index
    %c0_33 = arith.constant 0 : index
    %50 = vector.load %arg10[%c0_31, %c1, %c0_32, %c0_33] : memref<1x4x8x8xf32, #tpu.memory_space<vmem>>, vector<1x1x8x8xf32>
    %51 = vector.shape_cast %50 : vector<1x1x8x8xf32> to vector<8x8xf32>
    %52 = vector.shape_cast %49 : vector<8x8xf32> to vector<1x1x8x8xf32>
    tpu.vector_store %arg10[%c0_31, %c1, %c0_32, %c0_33], %52 {strides = array<i32>} : memref<1x4x8x8xf32, #tpu.memory_space<vmem>>, vector<1x1x8x8xf32>,
    %cst_34 = arith.constant dense<0.000000e+00> : vector<8x8xf32>
    %53 = tpu.matmul %49, %37, %cst_34 {dimension_numbers = #tpu.dot_dimension_numbers<[1], [0], [0], [1], [0, 0, 1, 1], [], []>} : vector<8x8xf32>, vector<8x8xf32>, vector<8x8xf32> -> vector<8x8xf32>
    %54 = vector.extract_strided_slice %9 {offsets = [0, 16], sizes = [8, 8], strides = [1, 1]} : vector<8x32xf32> to vector<8x8xf32>
    %55 = vector.extract_strided_slice %11 {offsets = [0, 16], sizes = [8, 8], strides = [1, 1]} : vector<8x32xf32> to vector<8x8xf32>
    %56 = vector.extract_strided_slice %13 {offsets = [0, 16], sizes = [8, 8], strides = [1, 1]} : vector<8x32xf32> to vector<8x8xf32>
    %cst_35 = arith.constant dense<0.000000e+00> : vector<8x8xf32>
    %57 = tpu.matmul %54, %55, %cst_35 {dimension_numbers = #tpu.dot_dimension_numbers<[1], [1], [0], [0], [0, 0, 1, 0], [], []>} : vector<8x8xf32>, vector<8x8xf32>, vector<8x8xf32> -> vector<8x8xf32>
    %58 = arith.subf %57, %15 : vector<8x8xf32>
    %cst_36 = arith.constant dense<0xFF800000> : vector<8xf32>
    %59 = vector.multi_reduction <maximumf>, %58, %cst_36 [1] : vector<8x8xf32> to vector<8xf32>
    %60 = vector.shape_cast %59 : vector<8xf32> to vector<8x1xf32>
    %61 = vector.broadcast %60 : vector<8x1xf32> to vector<8x8xf32>
    %62 = arith.subf %58, %61 : vector<8x8xf32>
    %63 = math.exp %62 : vector<8x8xf32>
    %cst_37 = arith.constant dense<0.000000e+00> : vector<8xf32>
    %64 = vector.multi_reduction <add>, %63, %cst_37 [1] : vector<8x8xf32> to vector<8xf32>
    %65 = vector.shape_cast %64 : vector<8xf32> to vector<8x1xf32>
    %66 = tpu.reciprocal %65 {approx = true} : vector<8x1xf32> -> vector<8x1xf32>
    %67 = vector.broadcast %66 : vector<8x1xf32> to vector<8x8xf32>
    %68 = arith.mulf %63, %67 : vector<8x8xf32>
    %c0_38 = arith.constant 0 : index
    %c2 = arith.constant 2 : index
    %c0_39 = arith.constant 0 : index
    %c0_40 = arith.constant 0 : index
    %69 = vector.load %arg10[%c0_38, %c2, %c0_39, %c0_40] : memref<1x4x8x8xf32, #tpu.memory_space<vmem>>, vector<1x1x8x8xf32>
    %70 = vector.shape_cast %69 : vector<1x1x8x8xf32> to vector<8x8xf32>
    %71 = vector.shape_cast %68 : vector<8x8xf32> to vector<1x1x8x8xf32>
    tpu.vector_store %arg10[%c0_38, %c2, %c0_39, %c0_40], %71 {strides = array<i32>} : memref<1x4x8x8xf32, #tpu.memory_space<vmem>>, vector<1x1x8x8xf32>,
    %cst_41 = arith.constant dense<0.000000e+00> : vector<8x8xf32>
    %72 = tpu.matmul %68, %56, %cst_41 {dimension_numbers = #tpu.dot_dimension_numbers<[1], [0], [0], [1], [0, 0, 1, 1], [], []>} : vector<8x8xf32>, vector<8x8xf32>, vector<8x8xf32> -> vector<8x8xf32>
    %73 = vector.extract_strided_slice %9 {offsets = [0, 24], sizes = [8, 8], strides = [1, 1]} : vector<8x32xf32> to vector<8x8xf32>
    %74 = vector.extract_strided_slice %11 {offsets = [0, 24], sizes = [8, 8], strides = [1, 1]} : vector<8x32xf32> to vector<8x8xf32>
    %75 = vector.extract_strided_slice %13 {offsets = [0, 24], sizes = [8, 8], strides = [1, 1]} : vector<8x32xf32> to vector<8x8xf32>
    %cst_42 = arith.constant dense<0.000000e+00> : vector<8x8xf32>
    %76 = tpu.matmul %73, %74, %cst_42 {dimension_numbers = #tpu.dot_dimension_numbers<[1], [1], [0], [0], [0, 0, 1, 0], [], []>} : vector<8x8xf32>, vector<8x8xf32>, vector<8x8xf32> -> vector<8x8xf32>
    %77 = arith.subf %76, %15 : vector<8x8xf32>
    %cst_43 = arith.constant dense<0xFF800000> : vector<8xf32>
    %78 = vector.multi_reduction <maximumf>, %77, %cst_43 [1] : vector<8x8xf32> to vector<8xf32>
    %79 = vector.shape_cast %78 : vector<8xf32> to vector<8x1xf32>
    %80 = vector.broadcast %79 : vector<8x1xf32> to vector<8x8xf32>
    %81 = arith.subf %77, %80 : vector<8x8xf32>
    %82 = math.exp %81 : vector<8x8xf32>
    %cst_44 = arith.constant dense<0.000000e+00> : vector<8xf32>
    %83 = vector.multi_reduction <add>, %82, %cst_44 [1] : vector<8x8xf32> to vector<8xf32>
    %84 = vector.shape_cast %83 : vector<8xf32> to vector<8x1xf32>
    %85 = tpu.reciprocal %84 {approx = true} : vector<8x1xf32> -> vector<8x1xf32>
    %86 = vector.broadcast %85 : vector<8x1xf32> to vector<8x8xf32>
    %87 = arith.mulf %82, %86 : vector<8x8xf32>
    %c0_45 = arith.constant 0 : index
    %c3 = arith.constant 3 : index
    %c0_46 = arith.constant 0 : index
    %c0_47 = arith.constant 0 : index
    %88 = vector.load %arg10[%c0_45, %c3, %c0_46, %c0_47] : memref<1x4x8x8xf32, #tpu.memory_space<vmem>>, vector<1x1x8x8xf32>
    %89 = vector.shape_cast %88 : vector<1x1x8x8xf32> to vector<8x8xf32>
    %90 = vector.shape_cast %87 : vector<8x8xf32> to vector<1x1x8x8xf32>
    tpu.vector_store %arg10[%c0_45, %c3, %c0_46, %c0_47], %90 {strides = array<i32>} : memref<1x4x8x8xf32, #tpu.memory_space<vmem>>, vector<1x1x8x8xf32>,
    %cst_48 = arith.constant dense<0.000000e+00> : vector<8x8xf32>
    %91 = tpu.matmul %87, %75, %cst_48 {dimension_numbers = #tpu.dot_dimension_numbers<[1], [0], [0], [1], [0, 0, 1, 1], [], []>} : vector<8x8xf32>, vector<8x8xf32>, vector<8x8xf32> -> vector<8x8xf32>
    %92 = tpu.concatenate %34, %53, %72, %91 in 1 : vector<8x8xf32>, vector<8x8xf32>, vector<8x8xf32>, vector<8x8xf32> -> vector<8x32xf32>
    %c0_49 = arith.constant 0 : index
    %c0_50 = arith.constant 0 : index
    %93 = vector.load %arg8[%c0_49, %c0_50] : memref<32x32xf32, #tpu.memory_space<vmem>>, vector<32x32xf32>
    %cst_51 = arith.constant dense<0.000000e+00> : vector<8x32xf32>
    %94 = tpu.matmul %92, %93, %cst_51 {dimension_numbers = #tpu.dot_dimension_numbers<[1], [0], [0], [1], [0, 0, 1, 1], [], []>} : vector<8x32xf32>, vector<32x32xf32>, vector<8x32xf32> -> vector<8x32xf32>
    %c0_52 = arith.constant 0 : index
    %c0_53 = arith.constant 0 : index
    %c0_54 = arith.constant 0 : index
    %95 = vector.load %arg9[%c0_52, %c0_53, %c0_54] : memref<1x8x32xf32, #tpu.memory_space<vmem>>, vector<1x8x32xf32>
    %96 = vector.shape_cast %95 : vector<1x8x32xf32> to vector<8x32xf32>
    %97 = vector.shape_cast %94 : vector<8x32xf32> to vector<1x8x32xf32>
    tpu.vector_store %arg9[%c0_52, %c0_53, %c0_54], %97 {strides = array<i32>} : memref<1x8x32xf32, #tpu.memory_space<vmem>>, vector<1x8x32xf32>,
    return
  }
  func.func @transform_0(%arg0: i32) -> (i32, i32, i32) {
    %c0_i32 = arith.constant 0 : i32
    %c0_i32_0 = arith.constant 0 : i32
    %c0_i32_1 = arith.constant 0 : i32
    return %arg0, %c0_i32, %c0_i32_0 : i32, i32, i32
  }
  func.func @transform_1(%arg0: i32) -> (i32, i32, i32) {
    %c0_i32 = arith.constant 0 : i32
    %c0_i32_0 = arith.constant 0 : i32
    %c0_i32_1 = arith.constant 0 : i32
    return %arg0, %c0_i32, %c0_i32_0 : i32, i32, i32
  }
  func.func @transform_2(%arg0: i32) -> (i32, i32, i32) {
    %c0_i32 = arith.constant 0 : i32
    %c0_i32_0 = arith.constant 0 : i32
    %c0_i32_1 = arith.constant 0 : i32
    return %arg0, %c0_i32, %c0_i32_0 : i32, i32, i32
  }
  func.func @transform_3(%arg0: i32) -> (i32, i32, i32) {
    %c0_i32 = arith.constant 0 : i32
    %c0_i32_0 = arith.constant 0 : i32
    %c0_i32_1 = arith.constant 0 : i32
    %c0_i32_2 = arith.constant 0 : i32
    return %c0_i32, %c0_i32_0, %c0_i32_1 : i32, i32, i32
  }
  func.func @transform_4(%arg0: i32) -> (i32, i32) {
    %c0_i32 = arith.constant 0 : i32
    %c0_i32_0 = arith.constant 0 : i32
    %c0_i32_1 = arith.constant 0 : i32
    return %c0_i32, %c0_i32_0 : i32, i32
  }
  func.func @transform_5(%arg0: i32) -> (i32, i32) {
    %c0_i32 = arith.constant 0 : i32
    %c0_i32_0 = arith.constant 0 : i32
    %c0_i32_1 = arith.constant 0 : i32
    return %c0_i32, %c0_i32_0 : i32, i32
  }
  func.func @transform_6(%arg0: i32) -> (i32, i32) {
    %c0_i32 = arith.constant 0 : i32
    %c0_i32_0 = arith.constant 0 : i32
    %c0_i32_1 = arith.constant 0 : i32
    return %c0_i32, %c0_i32_0 : i32, i32
  }
  func.func @transform_7(%arg0: i32) -> (i32, i32) {
    %c0_i32 = arith.constant 0 : i32
    %c0_i32_0 = arith.constant 0 : i32
    %c0_i32_1 = arith.constant 0 : i32
    return %c0_i32, %c0_i32_0 : i32, i32
  }
  func.func @transform_8(%arg0: i32) -> (i32, i32, i32) {
    %c0_i32 = arith.constant 0 : i32
    %c0_i32_0 = arith.constant 0 : i32
    %c0_i32_1 = arith.constant 0 : i32
    return %arg0, %c0_i32, %c0_i32_0 : i32, i32, i32
  }
  func.func @transform_9(%arg0: i32) -> (i32, i32, i32, i32) {
    %c0_i32 = arith.constant 0 : i32
    %c0_i32_0 = arith.constant 0 : i32
    %c0_i32_1 = arith.constant 0 : i32
    %c0_i32_2 = arith.constant 0 : i32
    return %arg0, %c0_i32, %c0_i32_0, %c0_i32_1 : i32, i32, i32, i32
  }
}

</mosaic_0001>

<bundles_post_ra>
// kernel: tpu_custom_call.1
= control target key start
LH: loop header
LB: loop body
LE: loop exit
PB: predicated region body
PF: predicated region fallthrough
CT: control target
= control target key end

     0   :  { %s2912_s0 = inlined_call_operand.hbm [shape: f32[2,8,32], index: 0, kind: input, shape index: {}]   ;;  %s2913_s1 = inlined_call_operand.hbm [shape: f32[2,8,32], index: 1, kind: input, shape index: {}]   ;;  %s2914_s2 = inlined_call_operand.hbm [shape: f32[2,8,32], index: 2, kind: input, shape index: {}]   ;;  %s2915_s3 = inlined_call_operand.vmem [shape: f32[1,8,8], index: 3, kind: input, shape index: {}]   ;;  %s2916_s4 = inlined_call_operand.hbm [shape: f32[32,32], index: 4, kind: input, shape index: {}]   ;;  %s2917_s5 = inlined_call_operand.hbm [shape: f32[32,32], index: 5, kind: input, shape index: {}]   ;;  %s2918_s6 = inlined_call_operand.hbm [shape: f32[32,32], index: 6, kind: input, shape index: {}]   ;;  %s2919_s7 = inlined_call_operand.hbm [shape: f32[32,32], index: 7, kind: input, shape index: {}]   ;;  %s2920_s8 = inlined_call_operand.hbm [shape: f32[2,8,32], index: 8, kind: output, shape index: {0}]   ;;  %s2921_s9 = inlined_call_operand.hbm [shape: f32[2,4,8,8], index: 9, kind: output, shape index: {1}]  }
   0x1   :  { %2948 = sst [smem:[#allocation29_spill]] %s2913_s1 }
   0x2   :  { %2949 = sst [smem:[#allocation30_spill]] %s2916_s4 }
   0x3   :  { %2950 = sst [smem:[#allocation31_spill]] %s2918_s6 }
   0x4   :  { %2951 = sst [smem:[#allocation32_spill]] %s2920_s8 }
   0x5   :  { %2952 = sst [smem:[#allocation33_spill]] %s2921_s9 }
   0x6   :  { %15 = vsyncpa [#allocation3], 0 }
   0x7   :  { %17 = vsyncpa [#allocation3 + $0x1], 0 }
   0x8   :  { %18 = vsyncpa [#allocation6], 0 }
   0x9   :  { %20 = vsyncpa [#allocation6 + $0x1], 0 }
   0xa   :  { %21 = vsyncpa [#allocation9], 0 }
   0xb   :  { %22 = vsyncpa [#allocation12], 0 }
   0xc   :  { %23 = vsyncpa [#allocation4], 0 }
   0xd   :  { %25 = vsyncpa [#allocation4 + $0x1], 0 }
   0xe   :  { %26 = vsyncpa [#allocation16], 0 }
   0xf   :  { %28 = vsyncpa [#allocation16 + $0x1], 0  ;;  %s2415_s30 = smov 0   ;;  %s2417_s10 = smov 0  }
  0x10   :  { %s2419_s11 = smov 0   ;;  %s2421_s12 = smov 0  }
  0x11 LB: > { %2953 = sst [smem:[#allocation23_spill]] %s2330_s30  ;;  %s2344_s13 = smov [#allocation8]   ;;  %s2342_s12 = sphi %s2421_s12, %s2993_s12   ;;  %s2338_s11 = sphi %s2419_s11, %s2997_s11   ;;  %s2334_s10 = sphi %s2417_s10, %s2996_s10   ;;  %s2330_s30 = sphi %s2415_s30, %s2995_s30  }
  0x12   : > { %2954 = sst [smem:[#allocation24_spill]] %s2342_s12  ;;  %s289_s14 = sshll.u32 %s2344_s13, 4  ;;  %s2441_s14 = int_to_ptr.vmem [resolvable:$true] %s289_s14 }
  0x13   : > { %s2436_s15 = sadd.s32 4294967295, %s2342_s12   ;;  %p1707_p0 = scmp.ge.s32.totalorder %s2342_s12, 1 }
  0x14   : > { %p2933_p1 = scmp.eq.s32.totalorder %s2436_s15, 0  ;;  %p274_p2 = scmp.lt.s32.totalorder %s2342_s12, 3 }
  0x15   : > { %s2345_s17 = smov [#allocation11]   ;;  %s2957_s4 = sld [smem:[#allocation30_spill]] }
  0x16   : > { %p2443_p3 = pnand %p1707_p0, %p274_p2  ;;  %s315_s18 = sshll.u32 %s2345_s17, 4  ;;  %s2456_s18 = int_to_ptr.vmem [resolvable:$true] %s315_s18 }
  0x18   : > { %s2955_s16 = scalar_select %p2443_p3, 1, 0 }
  0x19   : > { %p1926_p5 = pneg %p2443_p3 }
  0x1b   : > { %p2452_p6 = pnand %p1926_p5, %p2933_p1  ;;  %s2030_s22 = scalar_lea.hbm %s2957_s4, 512 }
  0x1c   : > { %p2031_p7 = scmp.ne.s32.totalorder %s2957_s4, %s2030_s22  ;;  %p2037_p11 = scmp.lt.u32.totalorder %s2030_s22, %s2957_s4 }
  0x1d   : > { %s2956_s19 = scalar_select %p2452_p6, 1, 0 }
  0x1e   : > { %p2466_p8 = pneg %p2452_p6 }
  0x20   : > { %s2958_s25 = scalar_select %p2466_p8, 1, 0 }
  0x21   : > { %p2033_p9 = pnand %p2466_p8, %p2031_p7 }
  0x23   : > { %p2034_p10 = pneg %p2033_p9 }
  0x25   : > { %p2039_p12 = pnand %p2037_p11, %p2034_p10 }
  0x27   : > { %2042 = shalt.err (!%p2039_p12)
}
  0x28   : > { %s2043_s28 = scalar_lea.vmem %s2441_s14, 512  ;;  %p2051_p5 = scmp.lt.s32.totalorder %s2441_s14, %s2441_s14 }
  0x29   : > { %p2044_p13 = scmp.ne.s32.totalorder %s2441_s14, %s2043_s28  ;;  %p2052_p4 = scmp.lt.s32.totalorder %s2043_s28, %s2043_s28 }
  0x2b   : > { %p2046_p0 = pnand %p2044_p13, %p2466_p8  ;;  %p2053_p7 = por %p2052_p4, %p2051_p5 }
  0x2d   : > { %p2047_p2 = pneg %p2046_p0 }
  0x2f   : > { %p2054_p9 = pnand %p2053_p7, %p2047_p2 }
  0x31   : > { %2057 = shalt.err (!%p2054_p9)
}
  0x32   : > { %s2923_s29 = smov 128   ;;  %s2925_s13 = smov 8  }
  0x33   : > { %1929 = dma.hbm_to_vmem [thread:$0]  (!%p2452_p6), %s2957_s4, 512, %s2441_s14, [#allocation9], %s2923_s29, %s2923_s29, %s2925_s13  }
  0x34   : > { %s2959_s6 = sld [smem:[#allocation31_spill]] }
  0x3a   : > { %s2058_s23 = scalar_lea.hbm %s2959_s6, 512 }
  0x3b   : > { %p2059_p4 = scmp.ne.s32.totalorder %s2959_s6, %s2058_s23  ;;  %p2065_p12 = scmp.lt.u32.totalorder %s2058_s23, %s2959_s6 }
  0x3d   : > { %p2061_p10 = pnand %p2059_p4, %p2466_p8 }
  0x3f   : > { %p2062_p11 = pneg %p2061_p10 }
  0x41   : > { %p2067_p13 = pnand %p2065_p12, %p2062_p11 }
  0x43   : > { %2070 = shalt.err (!%p2067_p13)
}
  0x44   : > { %s2071_s14 = scalar_lea.vmem %s2456_s18, 512  ;;  %p2079_p7 = scmp.lt.s32.totalorder %s2456_s18, %s2456_s18 }
  0x45   : > { %p2072_p0 = scmp.ne.s32.totalorder %s2456_s18, %s2071_s14  ;;  %p2080_p9 = scmp.lt.s32.totalorder %s2071_s14, %s2071_s14 }
  0x47   : > { %p2074_p2 = pnand %p2072_p0, %p2466_p8  ;;  %p2081_p4 = por %p2080_p9, %p2079_p7 }
  0x49   : > { %p2075_p5 = pneg %p2074_p2 }
  0x4b   : > { %p2082_p10 = pnand %p2081_p4, %p2075_p5 }
  0x4d   : > { %2085 = shalt.err (!%p2082_p10)
}
  0x4e   : > { %1935 = dma.hbm_to_vmem [thread:$0]  (!%p2452_p6), %s2959_s6, 512, %s2456_s18, [#allocation12], %s2923_s29, %s2923_s29, %s2925_s13  }
  0x4f   : > { %s1706_s21 = sadd.s32 4294967294, %s2342_s12   ;;  %s2518_s22 = sadd.s32 1, %s2342_s12  }
  0x50   : > { %2960 = sst [smem:[#allocation25_spill]] %s2518_s22  ;;  %s38_s23 = ssub.s32 %s2342_s12, %s2518_s22 }
  0x51   : > { %s41_s24 = sadd.s32 1, %s2338_s11  ;;  %p39_p11 = scmp.eq.s32.totalorder %s38_s23, 0 }
  0x52   : > { %p48_p12 = scmp.ne.s32.totalorder %s2338_s11, %s2334_s10  ;;  %p49_p13 = scmp.eq.s32.totalorder %s2342_s12, 0 }
  0x53   : > { %p54_p0 = scmp.ne.s32.totalorder %s2334_s10, %s2330_s30  ;;  %p235_p7 = scmp.eq.s32.totalorder %s2436_s15, 1 }
  0x54   : > { %s2529_s26 = scalar_select %p39_p11, %s2338_s11, %s41_s24  }
  0x55   : > { %p50_p2 = por %p49_p13, %p48_p12  ;;  %p2533_p5 = por %p2933_p1, %p54_p0 }
  0x56   : > { %2961 = sst [smem:[#allocation26_spill]] %s2529_s26  ;;  %p241_p9 = scmp.eq.s32.totalorder %s1706_s21, 1 }
  0x57   : > { %s2962_s27 = scalar_select %p2533_p5, 1, 0 }
  0x58   : > { %p1960_p4 = scmp.lt.s32.totalorder %s2342_s12, 2  ;;  %s2927_s18 = sand.u32 1, %s2338_s11  }
  0x59   : > { %p2540_p10 = por %p235_p7, %p48_p12  ;;  %p2544_p3 = por %p241_p9, %p54_p0 }
  0x5a   : > { %s2550_s17 = sshll.u32 %s2927_s18, 3  ;;  %s2553_s20 = sshll.u32 %s2342_s12, 7 }
  0x5b   : > { %s2963_s28 = scalar_select %p2540_p10, 1, 0 }
  0x5c   : > { %s2965_s14 = scalar_select %p2544_p3, 1, 0 }
  0x5d   : > { %2964 = sst [smem:[#allocation27_spill]] %s2963_s28  ;;  %p2555_p11 = pnand %p1960_p4, %p50_p2 }
  0x5e   : > { %2966 = sst [smem:[#allocation28_spill]] %s2965_s14  ;;  %s360_s21 = sand.u32 1, %s2342_s12  }
  0x5f   : > { %s2967_s23 = scalar_select %p2555_p11, 1, 0 }
  0x60   : > { %s2968_s1 = sld [smem:[#allocation29_spill]]  ;;  %s364_s18 = scalar_lea.vmem [#allocation5], %s2550_s17 }
  0x61   : > { %s371_s4 = sshll.u32 %s364_s18, 4  ;;  %s2348_s6 = smov [#allocation10]   ;;  %s2567_s4 = int_to_ptr.vmem [resolvable:$true] %s371_s4 }
  0x62   : > { %s2569_s26 = sshll.u32 %s2348_s6, 4  ;;  %s2571_s22 = scalar_lea.sflag [#allocation6], %s360_s21  ;;  %s303_s26 = int_to_ptr.vmem [resolvable:$true] %s2569_s26 }
  0x63   : > { %p2577_p13 = pneg %p2555_p11 }
  0x65   : > { %s2969_s29 = scalar_select %p2577_p13, 1, 0 }
  0x66   : > { %s2564_s13 = scalar_lea.hbm %s2968_s1, %s2553_s20  ;;  %s2091_s12 = scalar_lea.hbm %s2968_s1, 256 }
  0x67   : > { %s2086_s14 = scalar_lea.hbm %s2564_s13, 128  ;;  %p2092_p7 = scmp.lt.u32.totalorder %s2564_s13, %s2968_s1 }
  0x68   : > { %p2087_p12 = scmp.ne.s32.totalorder %s2564_s13, %s2086_s14  ;;  %p2093_p9 = scmp.lt.u32.totalorder %s2091_s12, %s2086_s14 }
  0x69   : > { %p2095_p1 = scmp.lt.u32.totalorder %s2086_s14, %s2564_s13 }
  0x6a   : > { %p2089_p0 = pnand %p2577_p13, %p2087_p12  ;;  %p2094_p4 = por %p2093_p9, %p2092_p7 }
  0x6c   : > { %p2090_p2 = pneg %p2089_p0  ;;  %p2096_p3 = por %p2095_p1, %p2094_p4 }
  0x6e   : > { %p2097_p10 = pnand %p2096_p3, %p2090_p2 }
  0x70   : > { %2100 = shalt.err (!%p2097_p10)
}
  0x71   : > { %s2101_s21 = scalar_lea.vmem %s2567_s4, 128  ;;  %s2349_s24 = smov [#allocation5]  }
  0x72   : > { %p2102_p12 = scmp.ne.s32.totalorder %s2567_s4, %s2101_s21  ;;  %s2106_s18 = sshll.u32 %s2349_s24, 4  ;;  %s2107_s18 = int_to_ptr.vmem [resolvable:$false] %s2106_s18 }
  0x73   : > { %s2108_s30 = scalar_lea.vmem %s2107_s18, 256  ;;  %p2109_p6 = scmp.lt.s32.totalorder %s2567_s4, %s2107_s18 }
  0x74   : > { %p2104_p0 = pnand %p2102_p12, %p2577_p13  ;;  %p2110_p8 = scmp.lt.s32.totalorder %s2108_s30, %s2101_s21 }
  0x76   : > { %p2105_p5 = pneg %p2104_p0  ;;  %p2111_p7 = por %p2110_p8, %p2109_p6 }
  0x78   : > { %p2112_p9 = pnand %p2111_p7, %p2105_p5 }
  0x7a   : > { %2115 = shalt.err (!%p2112_p9)
}
  0x7b   : > { %1945 = dma.hbm_to_vmem [thread:$0]  (!%p2555_p11), %s2564_s13, 128, %s2567_s4, %s2571_s22  }
  0x7c   : > { %s2116_s6 = scalar_lea.hbm %s2917_s5, 512  ;;  %p2970_p3 = scmp.ne.s32.totalorder %s2958_s25, 0 }
  0x7d   : > { %p2117_p1 = scmp.ne.s32.totalorder %s2917_s5, %s2116_s6  ;;  %p2123_p5 = scmp.lt.u32.totalorder %s2116_s6, %s2917_s5 }
  0x7f   : > { %p2119_p6 = pnand %p2117_p1, %p2970_p3 }
  0x81   : > { %p2120_p8 = pneg %p2119_p6 }
  0x83   : > { %p2125_p10 = pnand %p2123_p5, %p2120_p8 }
  0x85   : > { %2128 = shalt.err (!%p2125_p10)
}
  0x86   : > { %s2129_s30 = scalar_lea.vmem %s303_s26, 512  ;;  %p2137_p0 = scmp.lt.s32.totalorder %s303_s26, %s303_s26 }
  0x87   : > { %p2130_p2 = scmp.ne.s32.totalorder %s303_s26, %s2129_s30  ;;  %p2138_p7 = scmp.lt.s32.totalorder %s2129_s30, %s2129_s30 }
  0x89   : > { %p2132_p4 = pnand %p2130_p2, %p2970_p3  ;;  %p2139_p9 = por %p2138_p7, %p2137_p0 }
  0x8b   : > { %p2133_p12 = pneg %p2132_p4 }
  0x8d   : > { %p2140_p11 = pnand %p2139_p9, %p2133_p12 }
  0x8f   : > { %2143 = shalt.err (!%p2140_p11)
}
  0x90   : > { %p2971_p1 = scmp.ne.s32.totalorder %s2956_s19, 0  ;;  %s2972_s1 = smov 8  }
  0x91   : > { %s2973_s4 = smov 128   ;;  %s2350_s14 = smov [#allocation13]  }
  0x92   : > { %1932 = dma.hbm_to_vmem [thread:$0]  (!%p2971_p1), %s2917_s5, 512, %s303_s26, [#allocation9], %s2973_s4, %s2973_s4, %s2972_s1  }
  0x93   : > { %s328_s6 = sshll.u32 %s2350_s14, 4  ;;  %s2144_s18 = scalar_lea.hbm %s2919_s7, 512  ;;  %s329_s6 = int_to_ptr.vmem [resolvable:$true] %s328_s6 }
  0x94   : > { %p2145_p11 = scmp.ne.s32.totalorder %s2919_s7, %s2144_s18  ;;  %p2151_p5 = scmp.lt.u32.totalorder %s2144_s18, %s2919_s7 }
  0x96   : > { %p2147_p6 = pnand %p2145_p11, %p2970_p3 }
  0x98   : > { %p2148_p8 = pneg %p2147_p6 }
  0x9a   : > { %p2153_p10 = pnand %p2151_p5, %p2148_p8 }
  0x9c   : > { %2156 = shalt.err (!%p2153_p10)
}
  0x9d   : > { %s2157_s26 = scalar_lea.vmem %s329_s6, 512  ;;  %p2165_p0 = scmp.lt.s32.totalorder %s329_s6, %s329_s6 }
  0x9e   : > { %p2158_p2 = scmp.ne.s32.totalorder %s329_s6, %s2157_s26  ;;  %p2166_p7 = scmp.lt.s32.totalorder %s2157_s26, %s2157_s26 }
  0xa0   : > { %p2160_p4 = pnand %p2158_p2, %p2970_p3  ;;  %p2167_p9 = por %p2166_p7, %p2165_p0 }
  0xa2   : > { %p2161_p12 = pneg %p2160_p4 }
  0xa4   : > { %p2168_p13 = pnand %p2167_p9, %p2161_p12 }
  0xa6   : > { %2171 = shalt.err (!%p2168_p13)
}
  0xa7   : > { %1938 = dma.hbm_to_vmem [thread:$0]  (!%p2971_p1), %s2919_s7, 512, %s329_s6, [#allocation12], %s2973_s4, %s2973_s4, %s2972_s1  }
  0xa8   : > { %s2648_s13 = scalar_lea.hbm %s2912_s0, %s2553_s20  ;;  %s346_s19 = scalar_lea.vmem [#allocation2], %s2550_s17 }
  0xa9   : > { %s353_s12 = sshll.u32 %s346_s19, 4  ;;  %s2974_s14 = sand.u32 1, %s2338_s11   ;;  %s354_s12 = int_to_ptr.vmem [resolvable:$true] %s353_s12 }
  0xaa   : > { %s343_s24 = scalar_lea.sflag [#allocation3], %s2974_s14  ;;  %s2172_s21 = scalar_lea.hbm %s2648_s13, 128 }
  0xab   : > { %p2173_p13 = scmp.ne.s32.totalorder %s2648_s13, %s2172_s21  ;;  %p2975_p3 = scmp.ne.s32.totalorder %s2969_s29, 0 }
  0xac   : > { %s2177_s6 = scalar_lea.hbm %s2912_s0, 256  ;;  %p2178_p1 = scmp.lt.u32.totalorder %s2648_s13, %s2912_s0 }
  0xad   : > { %p2175_p11 = pnand %p2173_p13, %p2975_p3  ;;  %p2179_p8 = scmp.lt.u32.totalorder %s2177_s6, %s2172_s21 }
  0xae   : > { %p2181_p10 = scmp.lt.u32.totalorder %s2172_s21, %s2648_s13 }
  0xaf   : > { %p2176_p6 = pneg %p2175_p11  ;;  %p2180_p5 = por %p2179_p8, %p2178_p1 }
  0xb1   : > { %p2182_p2 = por %p2181_p10, %p2180_p5 }
  0xb3   : > { %p2183_p4 = pnand %p2182_p2, %p2176_p6 }
  0xb5   : > { %2186 = shalt.err (!%p2183_p4)
}
  0xb6   : > { %s2187_s26 = scalar_lea.vmem %s354_s12, 128  ;;  %s2351_s8 = smov [#allocation2]  }
  0xb7   : > { %p2188_p12 = scmp.ne.s32.totalorder %s354_s12, %s2187_s26  ;;  %s2192_s9 = sshll.u32 %s2351_s8, 4  ;;  %s2193_s9 = int_to_ptr.vmem [resolvable:$false] %s2192_s9 }
  0xb8   : > { %s2194_s25 = scalar_lea.vmem %s2193_s9, 256  ;;  %p2195_p9 = scmp.lt.s32.totalorder %s354_s12, %s2193_s9 }
  0xb9   : > { %p2190_p0 = pnand %p2188_p12, %p2975_p3  ;;  %p2196_p13 = scmp.lt.s32.totalorder %s2194_s25, %s2187_s26 }
  0xbb   : > { %p2191_p7 = pneg %p2190_p0  ;;  %p2197_p11 = por %p2196_p13, %p2195_p9 }
  0xbd   : > { %p2198_p1 = pnand %p2197_p11, %p2191_p7 }
  0xbf   : > { %2201 = shalt.err (!%p2198_p1)
}
  0xc0   : > { %p2976_p8 = scmp.ne.s32.totalorder %s2967_s23, 0  ;;  %s2674_s14 = scalar_lea.hbm %s2914_s2, %s2553_s20 }
  0xc1   : > { %s382_s21 = scalar_lea.vmem [#allocation7], %s2550_s17  ;;  %s2202_s4 = scalar_lea.hbm %s2674_s14, 128 }
  0xc2   : > { %1942 = dma.hbm_to_vmem [thread:$0]  (!%p2976_p8), %s2648_s13, 128, %s354_s12, %s343_s24  }
  0xc3   : > { %s389_s1 = sshll.u32 %s382_s21, 4  ;;  %p2203_p6 = scmp.ne.s32.totalorder %s2674_s14, %s2202_s4  ;;  %s390_s1 = int_to_ptr.vmem [resolvable:$true] %s389_s1 }
  0xc4   : > { %s2207_s13 = scalar_lea.hbm %s2914_s2, 256  ;;  %p2208_p2 = scmp.lt.u32.totalorder %s2674_s14, %s2914_s2 }
  0xc5   : > { %p2205_p5 = pnand %p2203_p6, %p2975_p3  ;;  %p2209_p4 = scmp.lt.u32.totalorder %s2207_s13, %s2202_s4 }
  0xc6   : > { %p2211_p0 = scmp.lt.u32.totalorder %s2202_s4, %s2674_s14 }
  0xc7   : > { %p2206_p10 = pneg %p2205_p5  ;;  %p2210_p12 = por %p2209_p4, %p2208_p2 }
  0xc9   : > { %p2212_p7 = por %p2211_p0, %p2210_p12 }
  0xcb   : > { %p2213_p9 = pnand %p2212_p7, %p2206_p10 }
  0xcd   : > { %2216 = shalt.err (!%p2213_p9)
}
  0xce   : > { %s2217_s17 = scalar_lea.vmem %s390_s1, 128  ;;  %s2352_s20 = smov [#allocation7]  }
  0xcf   : > { %p2218_p13 = scmp.ne.s32.totalorder %s390_s1, %s2217_s17  ;;  %s2222_s30 = sshll.u32 %s2352_s20, 4  ;;  %s2223_s30 = int_to_ptr.vmem [resolvable:$false] %s2222_s30 }
  0xd0   : > { %s2224_s26 = scalar_lea.vmem %s2223_s30, 256  ;;  %p2225_p6 = scmp.lt.s32.totalorder %s390_s1, %s2223_s30 }
  0xd1   : > { %p2220_p11 = pnand %p2218_p13, %p2975_p3  ;;  %p2226_p5 = scmp.lt.s32.totalorder %s2224_s26, %s2217_s17 }
  0xd3   : > { %p2221_p1 = pneg %p2220_p11  ;;  %p2227_p8 = por %p2226_p5, %p2225_p6 }
  0xd5   : > { %p2228_p2 = pnand %p2227_p8, %p2221_p1 }
  0xd7   : > { %2231 = shalt.err (!%p2228_p2)
}
  0xd8   : > { %p2977_p4 = scmp.ne.s32.totalorder %s2967_s23, 0  ;;  %p2978_p10 = scmp.ne.s32.totalorder %s2955_s16, 0 }
  0xd9   : > { %s2698_s29 = sand.u32 (!%p2978_p10), 1, %s2334_s10   ;;  %p2979_p3 = scmp.ne.s32.totalorder (!%p2978_p10), %s2962_s27, 0 }
  0xda   : > { %1948 = dma.hbm_to_vmem [thread:$0]  (!%p2977_p4), %s2674_s14, 128, %s390_s1, %s2571_s22  }
  0xdb   : > { %398 = sbr.rel (%p2978_p10) target bundleno = 2140 (0x85c), region = 52  ;;  %s2701_s8 = sshll.u32 (!%p2978_p10), %s2698_s29, 3 }
  0xdc   : > { %s401_s9 = scalar_lea.sflag (!%p2978_p10), [#allocation3], %s2698_s29  ;;  %s404_s25 = scalar_lea.vmem (!%p2978_p10), [#allocation2], %s2701_s8 }
  0xe2   : > { %2305 = dma.done.wait (%p2979_p3), %s401_s9, 128  }
  0xe3   : > { %2307 = vsyncadd (%p2979_p3), %s401_s9, 4294967168  ;;  %s409_s16 = sand.u32 1, %s2436_s15   ;;  %s413_s23 = scalar_lea.vmem [#allocation5], %s2701_s8 }
  0xe4   : > { %s410_s22 = scalar_lea.sflag [#allocation6], %s409_s16 }
  0xe5   : > { %2309 = dma.done.wait (%p2979_p3), %s410_s22, 256  }
  0xe6   : > { %2311 = vsyncadd (%p2979_p3), %s410_s22, 4294967040  ;;  %s422_s28 = scalar_lea.vmem [#allocation7], %s2701_s8  ;;  %p2980_p8 = scmp.eq.s32.totalorder %s2436_s15, 0 }
  0xe8   : > { %2313 = dma.done.wait (%p2980_p8), [#allocation9], 1024   ;;  %p2981_p12 = pmov %p2980_p8 }
  0xe9   : > { %p2982_p0 = pmov %p2980_p8 }
  0xea   : > { %2315 = vsyncadd (%p2981_p12), [#allocation9], 4294966272 }
  0xeb   : > { %2317 = dma.done.wait (%p2982_p0), [#allocation12], 1024   ;;  %p2983_p7 = pmov %p2982_p0 }
  0xec   : > { %v2353_v0 = vmov 0.0|0.0   ;;  %vm2354_vm0 = vmmov 0   ;;  %v2355_v1 = vmov 0.0   ;;  %v570_v2 = vld [vmem:[#allocation10] sm:$0xff]  ;;  %v571_v3 = vld [vmem:[#allocation10 + $0x8] sm:$0xff]  ;;  %v572_v7 = vld [vmem:[#allocation10 + $0x10] sm:$0xff] }
  0xed   : > { %2319 = vsyncadd (%p2983_p7), [#allocation12], 4294966272  ;;  %1882 = vmatprep.subr.bf16.mxu1 %v2353_v0  ;;  %1876 = vmatprep.subr.bf16.mxu0 %v2353_v0  ;;  %v492_v4 = vld [vmem:[#allocation8] sm:$0xff]  ;;  %v1883_v5 = vpack.c.bf16 %v571_v3, %v570_v2  ;;  %v493_v6 = vld [vmem:[#allocation8 + $0x8] sm:$0xff]  ;;  %vm496_vm1 = vcmask 261120   ;;  %vm725_vm2 = vcmask 64512  }
  0xee   : > { %1811 = vmatprep.mubr.msk.f32.mxu1 %vm2354_vm0, %v2355_v1  ;;  %1800 = vmatprep.mubr.msk.f32.mxu0 %vm2354_vm0, %v2355_v1  ;;  %v573_v8 = vld [vmem:[#allocation10 + $0x18] sm:$0xff]  ;;  %v1877_v9 = vpack.c.bf16 %v493_v6, %v492_v4  ;;  %v494_v10 = vld [vmem:[#allocation8 + $0x10] sm:$0xff]  ;;  %v489_v14 = vld [vmem:[%s413_s23] sm:$0xff]  ;;  %s2356_s27 = smov 120   ;;  %s2357_s19 = smov 112   ;;  %vm1406_vm3 = vcmask 130048  }
  0xef   : > { %v495_v11 = vld [vmem:[#allocation8 + $0x18] sm:$0xff]  ;;  %1884 = vmatpush3.bf16.msra.mxu1 %v1883_v5  ;;  %v1886_v12 = vpack.c.bf16 %v573_v8, %v572_v7  ;;  %s2358_s14 = smov 104   ;;  %v647_v20 = vld [vmem:[#allocation11] sm:$0xff]  ;;  %v648_v21 = vld [vmem:[#allocation11 + $0x8] sm:$0xff]  ;;  %s1728_s4 = sshll.u32 %s2698_s29, 5  ;;  %vm1408_vm4 = vcmask 195584  }
  0xf0   : > { %1878 = vmatpush3.bf16.msra.mxu0 %v1877_v9  ;;  %1885 = vmatprep.subr.bf16.mxu1 %v2353_v0  ;;  %v1880_v13 = vpack.c.bf16 %v495_v11, %v494_v10  ;;  %v488_v15 = vld [vmem:[%s404_s25] sm:$0xff]  ;;  %v1889_v23 = vpack.c.bf16 %v648_v21, %v647_v20  ;;  %s2782_s6 = scalar_lea.vmem [#allocation15], %s1728_s4  ;;  %s2359_s18 = smov 8  }
  0xf1   : > { %1879 = vmatprep.subr.bf16.mxu0 %v2353_v0  ;;  %v649_v22 = vld [vmem:[#allocation11 + $0x10] sm:$0xff]  ;;  %v650_v24 = vld [vmem:[#allocation11 + $0x18] sm:$0xff]  ;;  %s2360_s13 = smov 16   ;;  %s2361_s12 = smov 24  }
  0xf2   : > { %v1892_v25 = vpack.c.bf16 %v650_v24, %v649_v22  ;;  %v490_v26 = vld [vmem:[%s422_s28] sm:$0xff]  ;;  %s2984_s24 = sld [smem:[#allocation27_spill]]  ;;  %s1755_s17 = sshll.u32 %s2436_s15, 9 }
  0xf3   : > { %1887 = vmatpush3.bf16.msra.mxu1 %v1886_v12  ;;  %v491_v27 = vld [vmem:[%s2915_s3] sm:$0xff]  ;;  %s1520_s20 = sshll.u32 %s2782_s6, 4  ;;  %s2985_s9 = sld [smem:[#allocation33_spill]]  ;;  %s2835_s20 = int_to_ptr.vmem [resolvable:$true] %s1520_s20 }
  0xf4   : > { %1881 = vmatpush3.bf16.msra.mxu0 %v1880_v13  ;;  %1825 = vmatprep.subr.mxu1 %v2355_v1  ;;  %v724_v28 = vmul.f32 1e+09, %v491_v27  ;;  %s1494_s16 = scalar_lea.sflag [#allocation16], %s2698_s29  ;;  %s2232_s22 = scalar_lea.vmem %s2835_s20, 512 }
  0xf5   : > { %1888 = vmatprep.subr.bf16.mxu0 %v2353_v0  ;;  %p2233_p9 = scmp.ne.s32.totalorder %s2835_s20, %s2232_s22  ;;  %s2362_s23 = smov [#allocation15]  }
  0xf6   : > { %1812 = vmatmul.mubr.msk.f32.vlgmr.msra.gmra.mrb[0].mxu1 %vm496_vm1, %v489_v14  ;;  %s2236_s28 = sshll.u32 %s2362_s23, 4  ;;  %s2237_s28 = int_to_ptr.vmem [resolvable:$false] %s2236_s28 }
  0xf7   : > { %1801 = vmatmul.mubr.msk.f32.vlgmr.msra.gmra.mrb[0].mxu0 %vm496_vm1, %v488_v15  ;;  %1827 = vmatprep.mubr.msk.f32.mxu1 %vm2354_vm0, %v2355_v1  ;;  %p2239_p6 = scmp.lt.s32.totalorder %s2835_s20, %s2237_s28 }
  0xf8   : > { %1822 = vmatprep.mubr.msk.f32.mxu0 %vm2354_vm0, %v2355_v1  ;;  %1890 = vmatpush3.bf16.msra.mxu0 %v1889_v23  ;;  %p2986_p13 = scmp.ne.s32.totalorder %s2984_s24, 0 }
  0xf9   : > { %1891 = vmatprep.subr.bf16.mxu0 %v2353_v0  ;;  %s2833_s25 = scalar_lea.hbm %s2985_s9, %s1755_s17 }
  0xfa   : > { %p2234_p11 = pnand %p2233_p9, %p2986_p13 }
  0xfc   : > { %1893 = vmatpush3.bf16.msra.mxu0 %v1892_v25  ;;  %p2235_p1 = pneg %p2234_p11 }
  0xfd   : > { %1845 = vmatprep.subr.mxu0 %v2355_v1 }
  0xff   : > { %1823 = vmatmul.mubr.msk.f32.vlgmr.msra.gmra.mrb[2].mxu0 %vm496_vm1, %v490_v26 }
 0x100   : > { %1847 = vmatprep.mubr.msk.f32.mxu0 %vm2354_vm0, %v2355_v1 }
 0x1c9   : > { %v643_v16 = vpop.f32.mrb[0].mxu1 }
 0x1ca   : > { %890 = vrot.lane.b32.xlu1 %v643_v16, %s2356_s27  ;;  %v1813_v17 = vpop.f32.mrb[1].mxu1  ;;  %1826 = vmatpush3.xpose.msk.msra.mxu1 %vm725_vm2, %v643_v16  ;;  %v566_v18 = vpop.f32.mrb[0].mxu0 }
 0x1cb   : > { %v1802_v19 = vpop.f32.mrb[1].mxu0  ;;  %1830 = vmatprep.subr.mxu1 %v2355_v1 }
 0x1cd   : > { %1828 = vmatmul.mubr.msk.f32.vlgmr.msra.gmra.mrb[2].mxu1 %vm725_vm2, %v566_v18 }
 0x1ce   : > { %888 = vrot.lane.b32.xlu1 %v566_v18, %s2356_s27  ;;  %1832 = vmatprep.mubr.msk.f32.mxu1 %vm2354_vm0, %v2355_v1 }
 0x1d2   : > { %1057 = vrot.lane.b32.xlu1 %v566_v18, %s2357_s19  ;;  %v2766_v38 = vpop.f32.mrb[2].mxu0 }
 0x1d3   : > { %v1824_v39 = vpop.f32.mrb[3].mxu0  ;;  %1831 = vmatpush3.msra.mxu1 %v2766_v38 }
 0x1d4   : > { %1835 = vmatprep.subr.mxu1 %v2355_v1 }
 0x1d6   : > { %1227 = vrot.lane.b32.xlu1 %v643_v16, %s2358_s14 }
 0x1da   : > { %1225 = vrot.lane.b32.xlu1 %v566_v18, %s2358_s14 }
 0x23c   : > { %v891_v40 = vpop.permute.xlu1 %890 }
 0x240   : > { %v889_v41 = vpop.permute.xlu1 %888 }
 0x244   : > { %v1058_v42 = vpop.permute.xlu1 %1057 }
 0x248   : > { %v1228_v45 = vpop.permute.xlu1 %1227 }
 0x24c   : > { %v1226_v47 = vpop.permute.xlu1 %1225 }
 0x2a0   : > { %v798_v29 = vpop.f32.mrb[2].mxu1 }
 0x2a1   : > { %v802_v30 = vsub.f32 %v798_v29, %v724_v28  ;;  %v1829_v31 = vpop.f32.mrb[3].mxu1  ;;  %v1411_v29 = vld [vmem:[#allocation13 + $0x8] sm:$0xff] }
 0x2a2   : > { %v1412_v31 = vld [vmem:[#allocation13 + $0x10] sm:$0xff] }
 0x2a3   : > { %v803_v32 = vsel %vm725_vm2, %v802_v30, -inf }
 0x2a4   : > { %804 = vmax.xlane.f32.xlu0 %v803_v32  ;;  %v1413_v32 = vld [vmem:[#allocation13 + $0x18] sm:$0xff] }
 0x331   : > { %v805_v33 = vpop.xlane.xlu0 %804 }
 0x332   : > { %v806_v34 = vsub.f32 %v802_v30, %v805_v33  ;;  %v1898_v33 = vpack.c.bf16 %v1413_v32, %v1412_v31 }
 0x334   : > { %v807_v35 = vmul.f32 1.442695, %v806_v34 }
 0x336   : > { %2014 = vpow2.f32 %v807_v35 }
 0x340   : > { %v2015_v36 = vpop.eup %2014 }
 0x341   : > { %v809_v37 = vsel %vm725_vm2, %v2015_v36, 0.0 }
 0x342   : > { %810 = vadd.xlane.f32.xlu0 %v809_v37 }
 0x358   : > { %1059 = vrot.lane.b32.xlu0 %v643_v16, %s2357_s19 }
 0x3cf   : > { %v811_v43 = vpop.xlane.xlu0 %810 }
 0x3d0   : > { %2016 = vrcp.f32 %v811_v43 }
 0x3d3   : > { %v1060_v44 = vpop.permute.xlu0 %1059 }
 0x3d4   : > { %1846 = vmatpush3.xpose.msk.msra.mxu0 %vm725_vm2, %v1060_v44 }
 0x3d5   : > { %1855 = vmatprep.subr.mxu0 %v2355_v1 }
 0x3d7   : > { %1848 = vmatmul.mubr.msk.f32.vlgmr.msra.gmra.mrb[4].mxu0 %vm725_vm2, %v1058_v42 }
 0x3d8   : > { %1856 = vmatpush3.xpose.msk.msra.mxu0 %vm725_vm2, %v1228_v45  ;;  %1857 = vmatprep.mubr.msk.f32.mxu0 %vm2354_vm0, %v2355_v1 }
 0x3d9   : > { %1894 = vmatprep.subr.bf16.mxu0 %v2353_v0 }
 0x3da   : > { %v2017_v46 = vpop.eup %2016 }
 0x3db   : > { %v813_v48 = vmul.f32 %v2017_v46, %v2015_v36  ;;  %1858 = vmatmul.mubr.msk.f32.vlgmr.msra.gmra.mrb[6].mxu0 %vm725_vm2, %v1226_v47 }
 0x3dc   : > { %1873 = vmatprep.mubr.msk.f32.mxu0 %vm2354_vm0, %v2355_v1 }
 0x3dd   : > { %814 = vst.msk [vmem:[%s2782_s6] sm:$0xff] %vm725_vm2, %v813_v48  ;;  %1833 = vmatmul.mubr.msk.f32.vlgmr.msra.gmra.mrb[4].mxu1 %vm725_vm2, %v813_v48 }
 0x3de   : > { %1836 = vmatpush3.xpose.msk.msra.mxu1 %vm725_vm2, %v891_v40  ;;  %1837 = vmatprep.mubr.msk.f32.mxu1 %vm2354_vm0, %v2355_v1 }
 0x3df   : > { %1840 = vmatprep.subr.mxu1 %v2355_v1 }
 0x3e1   : > { %1838 = vmatmul.mubr.msk.f32.vlgmr.msra.gmra.mrb[6].mxu1 %vm725_vm2, %v889_v41 }
 0x3e2   : > { %1842 = vmatprep.mubr.msk.f32.mxu1 %vm2354_vm0, %v2355_v1 }
 0x4aa   : > { %v1131_v49 = vpop.f32.mrb[4].mxu0 }
 0x4ab   : > { %v1135_v50 = vsub.f32 %v1131_v49, %v724_v28  ;;  %v1849_v51 = vpop.f32.mrb[5].mxu0 }
 0x4ad   : > { %v1136_v52 = vsel %vm725_vm2, %v1135_v50, -inf }
 0x4ae   : > { %1137 = vmax.xlane.f32.xlu0 %v1136_v52  ;;  %v1299_v53 = vpop.f32.mrb[6].mxu0 }
 0x4af   : > { %v1859_v54 = vpop.f32.mrb[7].mxu0  ;;  %v1303_v60 = vsub.f32 %v1299_v53, %v724_v28 }
 0x4b0   : > { %v2795_v55 = vpop.f32.mrb[4].mxu1 }
 0x4b1   : > { %v1834_v56 = vpop.f32.mrb[5].mxu1  ;;  %v1304_v62 = vsel %vm725_vm2, %v1303_v60, -inf }
 0x4b4   : > { %v962_v57 = vpop.f32.mrb[6].mxu1 }
 0x4b5   : > { %v966_v58 = vsub.f32 %v962_v57, %v724_v28  ;;  %v1839_v59 = vpop.f32.mrb[7].mxu1  ;;  %v1410_v28 = vld [vmem:[#allocation13] sm:$0xff] }
 0x4b6   : > { %v1895_v30 = vpack.c.bf16 %v1411_v29, %v1410_v28 }
 0x4b7   : > { %v967_v61 = vsel %vm725_vm2, %v966_v58, -inf }
 0x4b8   : > { %968 = vmax.xlane.f32.xlu1 %v967_v61  ;;  %1896 = vmatpush3.bf16.msra.mxu0 %v1895_v30 }
 0x4b9   : > { %1897 = vmatprep.subr.bf16.mxu0 %v2353_v0 }
 0x4bc   : > { %1305 = vmax.xlane.f32.xlu1 %v1304_v62  ;;  %1899 = vmatpush3.bf16.msra.mxu0 %v1898_v33 }
 0x53b   : > { %v1138_v63 = vpop.xlane.xlu0 %1137 }
 0x53c   : > { %v1139_v2 = vsub.f32 %v1135_v50, %v1138_v63 }
 0x53e   : > { %v1140_v3 = vmul.f32 1.442695, %v1139_v2 }
 0x540   : > { %2018 = vpow2.f32 %v1140_v3 }
 0x545   : > { %v969_v4 = vpop.xlane.xlu1 %968 }
 0x546   : > { %v970_v12 = vsub.f32 %v966_v58, %v969_v4 }
 0x548   : > { %v971_v13 = vmul.f32 1.442695, %v970_v12 }
 0x549   : > { %v1306_v5 = vpop.xlane.xlu1 %1305 }
 0x54a   : > { %v2019_v6 = vpop.eup %2018  ;;  %v1307_v7 = vsub.f32 %v1303_v60, %v1306_v5 }
 0x54b   : > { %v1142_v8 = vsel %vm725_vm2, %v2019_v6, 0.0 }
 0x54c   : > { %v1308_v9 = vmul.f32 1.442695, %v1307_v7  ;;  %1143 = vadd.xlane.f32.xlu0 %v1142_v8 }
 0x54e   : > { %2020 = vpow2.f32 %v1308_v9 }
 0x54f   : > { %2022 = vpow2.f32 %v971_v13 }
 0x558   : > { %v2021_v10 = vpop.eup %2020 }
 0x559   : > { %v1310_v11 = vsel %vm725_vm2, %v2021_v10, 0.0  ;;  %v2023_v14 = vpop.eup %2022 }
 0x55a   : > { %1311 = vadd.xlane.f32.xlu1 %v1310_v11  ;;  %v973_v15 = vsel %vm725_vm2, %v2023_v14, 0.0 }
 0x562   : > { %981 = vrot.lane.b32.xlu0 %v2766_v38, %s2356_s27  ;;  %s2238_s27 = scalar_lea.vmem %s2237_s28, 1024 }
 0x563   : > { %p2240_p5 = scmp.lt.s32.totalorder %s2238_s27, %s2232_s22 }
 0x565   : > { %p2241_p2 = por %p2240_p5, %p2239_p6 }
 0x567   : > { %p2242_p4 = pnand %p2241_p2, %p2235_p1 }
 0x56b   : > { %1149 = vrot.lane.b32.xlu1 %v2766_v38, %s2357_s19 }
 0x58f   : > { %974 = vadd.xlane.f32.xlu1 %v973_v15 }
 0x5a0   : > { %1317 = vrot.lane.b32.xlu1 %v2766_v38, %s2358_s14 }
 0x5d9   : > { %v1144_v16 = vpop.xlane.xlu0 %1143 }
 0x5da   : > { %2024 = vrcp.f32 %v1144_v16 }
 0x5dd   : > { %v982_v17 = vpop.permute.xlu0 %981 }
 0x5de   : > { %1841 = vmatpush3.msra.mxu1 %v982_v17 }
 0x5df   : > { %1850 = vmatprep.subr.mxu1 %v2355_v1 }
 0x5e4   : > { %v2025_v18 = vpop.eup %2024 }
 0x5e5   : > { %v1146_v19 = vmul.f32 %v2025_v18, %v2019_v6 }
 0x5e7   : > { %1741 = vst.msk [vmem:[%s2782_s6 + $0x10] sm:$0xff] %vm725_vm2, %v1146_v19  ;;  %v1312_v20 = vpop.xlane.xlu1 %1311 }
 0x5e8   : > { %2026 = vrcp.f32 %v1312_v20 }
 0x5eb   : > { %v1150_v23 = vpop.permute.xlu1 %1149 }
 0x5f2   : > { %v2027_v21 = vpop.eup %2026 }
 0x5f3   : > { %v1314_v22 = vmul.f32 %v2027_v21, %v2021_v10 }
 0x5f5   : > { %1745 = vst.msk [vmem:[%s2782_s6 + $0x18] sm:$0xff] %vm725_vm2, %v1314_v22 }
 0x61c   : > { %v975_v24 = vpop.xlane.xlu1 %974 }
 0x61d   : > { %2028 = vrcp.f32 %v975_v24 }
 0x620   : > { %v1318_v27 = vpop.permute.xlu1 %1317 }
 0x627   : > { %v2029_v25 = vpop.eup %2028 }
 0x628   : > { %v977_v26 = vmul.f32 %v2029_v25, %v2023_v14 }
 0x62a   : > { %1737 = vst.msk [vmem:[%s2782_s6 + $0x8] sm:$0xff] %vm725_vm2, %v977_v26  ;;  %1843 = vmatmul.mubr.msk.f32.vlgmr.msra.gmra.mrb[8].mxu1 %vm725_vm2, %v977_v26 }
 0x62b   : > { %1851 = vmatpush3.msra.mxu1 %v1150_v23  ;;  %1852 = vmatprep.mubr.msk.f32.mxu1 %vm2354_vm0, %v2355_v1 }
 0x62c   : > { %1860 = vmatprep.subr.mxu1 %v2355_v1 }
 0x62e   : > { %1853 = vmatmul.mubr.msk.f32.vlgmr.msra.gmra.mrb[10].mxu1 %vm725_vm2, %v1146_v19 }
 0x62f   : > { %1861 = vmatpush3.msra.mxu1 %v1318_v27  ;;  %1862 = vmatprep.mubr.msk.f32.mxu1 %vm2354_vm0, %v2355_v1 }
 0x632   : > { %1863 = vmatmul.mubr.msk.f32.vlgmr.msra.gmra.mrb[12].mxu1 %vm725_vm2, %v1314_v22 }
 0x6fd   : > { %v1053_v34 = vpop.f32.mrb[8].mxu1 }
 0x6fe   : > { %1394 = vrot.lane.b32.xlu0 %v1053_v34, %s2359_s18  ;;  %v1844_v35 = vpop.f32.mrb[9].mxu1 }
 0x701   : > { %v1221_v36 = vpop.f32.mrb[10].mxu1 }
 0x702   : > { %1398 = vrot.lane.b32.xlu1 %v1221_v36, %s2360_s13  ;;  %v1854_v1 = vpop.f32.mrb[11].mxu1 }
 0x705   : > { %v1389_v37 = vpop.f32.mrb[12].mxu1 }
 0x706   : > { %1402 = vrot.lane.b32.xlu0 %v1389_v37, %s2361_s12  ;;  %v1864_v0 = vpop.f32.mrb[13].mxu1 }
 0x770   : > { %v1395_v38 = vpop.permute.xlu0 %1394 }
 0x771   : > { %v1405_v40 = vsel %vm725_vm2, %v2795_v55, %v1395_v38 }
 0x774   : > { %v1399_v39 = vpop.permute.xlu1 %1398 }
 0x775   : > { %v1407_v41 = vsel %vm1406_vm3, %v1405_v40, %v1399_v39 }
 0x778   : > { %v1403_v42 = vpop.permute.xlu0 %1402 }
 0x779   : > { %v1409_v43 = vsel %vm1408_vm4, %v1407_v41, %v1403_v42 }
 0x77a   : > { %1874 = vmatmul.mubr.msk.f32.vlgmr.msra.gmra.mrb[8].mxu0 %vm496_vm1, %v1409_v43 }
 0x77b   : > { %2245 = shalt.err (!%p2242_p4)
}
 0x77c   : > { %s2246_s19 = scalar_lea.hbm %s2833_s25, 512  ;;  %s2250_s1 = scalar_lea.hbm %s2985_s9, 1024 }
 0x77d   : > { %p2247_p10 = scmp.ne.s32.totalorder %s2833_s25, %s2246_s19  ;;  %p2251_p12 = scmp.lt.u32.totalorder %s2833_s25, %s2985_s9 }
 0x77e   : > { %p2252_p0 = scmp.lt.u32.totalorder %s2250_s1, %s2246_s19  ;;  %p2254_p9 = scmp.lt.u32.totalorder %s2246_s19, %s2833_s25 }
 0x77f   : > { %p2248_p3 = pnand %p2247_p10, %p2986_p13 }
 0x780   : > { %p2253_p7 = por %p2252_p0, %p2251_p12 }
 0x781   : > { %p2249_p8 = pneg %p2248_p3 }
 0x782   : > { %p2255_p11 = por %p2254_p9, %p2253_p7 }
 0x784   : > { %p2256_p1 = pnand %p2255_p11, %p2249_p8 }
 0x786   : > { %2259 = shalt.err (!%p2256_p1)
}
 0x787   : > { %s2363_s13 = smov 128   ;;  %s1750_s12 = sshll.u32 %s2436_s15, 7 }
 0x788   : > { %1923 = dma.vmem_to_hbm [thread:$0]  (%p2986_p13), %s2835_s20, 512, %s2833_s25, %s1494_s16, %s2363_s13, %s2363_s13, %s2359_s18  }
 0x789   : > { %s480_s17 = scalar_lea.vmem [#allocation14], %s2701_s8  ;;  %s2987_s23 = sld [smem:[#allocation32_spill]] }
 0x78a   : > { %s1507_s30 = sshll.u32 %s480_s17, 4  ;;  %s1489_s27 = scalar_lea.sflag [#allocation4], %s2698_s29  ;;  %s2869_s30 = int_to_ptr.vmem [resolvable:$true] %s1507_s30 }
 0x78b   : > { %s2260_s19 = scalar_lea.vmem %s2869_s30, 128  ;;  %s2364_s15 = smov [#allocation14]  }
 0x78c   : > { %p2261_p6 = scmp.ne.s32.totalorder %s2869_s30, %s2260_s19  ;;  %s2264_s8 = sshll.u32 %s2364_s15, 4  ;;  %s2265_s8 = int_to_ptr.vmem [resolvable:$false] %s2264_s8 }
 0x78d   : > { %s2266_s18 = scalar_lea.vmem %s2265_s8, 256  ;;  %p2267_p4 = scmp.lt.s32.totalorder %s2869_s30, %s2265_s8 }
 0x78e   : > { %p2262_p5 = pnand %p2261_p6, %p2986_p13  ;;  %p2268_p10 = scmp.lt.s32.totalorder %s2266_s18, %s2260_s19 }
 0x78f   : > { %s2867_s28 = scalar_lea.hbm %s2987_s23, %s1750_s12 }
 0x790   : > { %p2263_p2 = pneg %p2262_p5  ;;  %p2269_p3 = por %p2268_p10, %p2267_p4 }
 0x792   : > { %p2270_p8 = pnand %p2269_p3, %p2263_p2 }
 0x84d   : > { %v1483_v44 = vpop.f32.mrb[8].mxu0 }
 0x84e   : > { %1487 = vst.msk [vmem:[%s480_s17] sm:$0xff] %vm496_vm1, %v1483_v44  ;;  %v1875_v45 = vpop.f32.mrb[9].mxu0 }
 0x84f   : > { %2273 = shalt.err (!%p2270_p8)
}
 0x850   : > { %s2274_s29 = scalar_lea.hbm %s2867_s28, 128  ;;  %s2278_s16 = scalar_lea.hbm %s2987_s23, 256 }
 0x851   : > { %p2275_p12 = scmp.ne.s32.totalorder %s2867_s28, %s2274_s29  ;;  %p2279_p9 = scmp.lt.u32.totalorder %s2867_s28, %s2987_s23 }
 0x852   : > { %p2280_p11 = scmp.lt.u32.totalorder %s2278_s16, %s2274_s29  ;;  %p2282_p6 = scmp.lt.u32.totalorder %s2274_s29, %s2867_s28 }
 0x853   : > { %p2276_p0 = pnand %p2275_p12, %p2986_p13 }
 0x854   : > { %p2281_p1 = por %p2280_p11, %p2279_p9 }
 0x855   : > { %p2277_p7 = pneg %p2276_p0 }
 0x856   : > { %p2283_p5 = por %p2282_p6, %p2281_p1 }
 0x858   : > { %p2284_p2 = pnand %p2283_p5, %p2277_p7 }
 0x85a   : > { %2287 = shalt.err (!%p2284_p2)
}
 0x85b   : > { %1922 = dma.vmem_to_hbm [thread:$0]  (%p2986_p13), %s2869_s30, 128, %s2867_s28, %s1489_s27  }
 0x85c PF: > { %s2988_s1 = sld [smem:[#allocation23_spill]]  ;;  %s2989_s4 = sld [smem:[#allocation28_spill]] }
 0x85d   : > { %s2990_s6 = sld [smem:[#allocation24_spill]] }
 0x862   : > { %s1535_s13 = sand.u32 1, %s2988_s1   ;;  %p2991_p4 = scmp.ne.s32.totalorder %s2989_s4, 0 }
 0x863   : > { %p2992_p10 = scmp.ge.s32.totalorder %s2990_s6, 2  ;;  %s1536_s12 = scalar_lea.sflag [#allocation4], %s1535_s13 }
 0x865   : > { %p1950_p3 = pnand %p2992_p10, %p2991_p4 }
 0x867   : > { %2321 = dma.done.wait (!%p1950_p3), %s1536_s12, 128  }
 0x868   : > { %2323 = vsyncadd (!%p1950_p3), %s1536_s12, 4294967168  ;;  %s1545_s17 = scalar_lea.sflag [#allocation16], %s1535_s13 }
 0x869   : > { %2325 = dma.done.wait (!%p1950_p3), %s1545_s17, 512  }
 0x86a   : > { %2327 = vsyncadd (!%p1950_p3), %s1545_s17, 4294966784  ;;  %s2993_s12 = sld [smem:[#allocation25_spill]]  ;;  %s2994_s24 = sld [smem:[#allocation26_spill]] }
 0x86b   : > { %s2995_s30 = smov %s2334_s10  ;;  %s2996_s10 = smov %s2338_s11 }
 0x870   : > { %p31_p13 = scmp.ge.s32.totalorder %s2993_s12, 4   ;;  %s2997_s11 = smov %s2994_s24 }
 0x872   :  { %33 = sbr.rel (!%p31_p13) target bundleno = 17 (0x11), region = 157 }
 0x879   :  { %1550 = vsyncpa [#allocation3], 1 }
 0x87a   :  { %1552 = vsyncpa [#allocation3 + $0x1], 1 }
 0x87b   :  { %1553 = vsyncpa [#allocation6], 1 }
 0x87c   :  { %1555 = vsyncpa [#allocation6 + $0x1], 1 }
 0x87d   :  { %1556 = vsyncpa [#allocation9], 1 }
 0x87e   :  { %1557 = vsyncpa [#allocation12], 1 }
 0x87f   :  { %1558 = vsyncpa [#allocation4], 1 }
 0x880   :  { %1560 = vsyncpa [#allocation4 + $0x1], 1 }
 0x881   :  { %1561 = vsyncpa [#allocation16], 1 }
 0x882   :  { %1563 = vsyncpa [#allocation16 + $0x1], 1 }

</bundles_post_ra>
